<compile_context>
chip_gen: v6e
topology: v6e:2x2x1
jax: 0.10.0
libtpu: 0.0.40
codegen_flags: <defaults>
</compile_context>

<pallas_src>
import jax
import jax.numpy as jnp
from jax.experimental import pallas as pl
from jax.experimental.pallas import tpu as pltpu

K_IN = 28 * 28          # 784
K_PAD = 896             # 7 * 128 (lane-dense K)
HID = 256
N_OUT = 10
N_PAD = 128             # lane-dense output


def mlp_kernel(x_ref, w1_ref, b1_ref, w2_ref, b2_ref, o_ref):
    # fc1: (TB, 896)bf16 @ (896, 256)bf16 -> f32 accum
    h = jnp.dot(x_ref[...], w1_ref[...], preferred_element_type=jnp.float32)
    # bias + ReLU in f32
    h = jnp.maximum(h + b1_ref[...], 0.0)
    # Dropout(p=0.5): identity (PyTorch eval semantics).
    # TODO(synk): training-mode dropout would use pltpu.prng_seed /
    # pltpu.prng_random_bits with 1/(1-p) scaling.
    # fc2: (TB, 256)bf16 @ (256, 128)bf16 -> f32, lane-dense (128) output
    o_ref[...] = (
        jnp.dot(h.astype(jnp.bfloat16), w2_ref[...],
                preferred_element_type=jnp.float32)
        + b2_ref[...]
    )


def _round_up(x, m):
    return ((x + m - 1) // m) * m


def net_forward(x, w1, b1, w2, b2, *, tb=512):
    """x: any shape flattening to (-1, 784). Weights stored in x-out layout:
    w1 (784, 256), b1 (1, 256), w2 (256, 10), b2 (1, 10). Returns (B, 10) f32.
    """
    x2d = x.reshape(-1, K_IN).astype(jnp.float32)
    B = x2d.shape[0]

    # --- batch tile size: multiple of 8, capped at `tb` -----------------
    B8 = _round_up(B, 8)
    TB = _round_up(min(tb, B8), 8)
    B_pad = _round_up(B8, TB)

    # --- pad x: batch -> B_pad, K -> 896; cast to bf16 ------------------
    x_pad = jnp.pad(x2d, ((0, B_pad - B), (0, K_PAD - K_IN)))
    x_bf = x_pad.astype(jnp.bfloat16)

    # --- pad / cast params (zero padding is numerically exact) ----------
    w1p = jnp.pad(w1.astype(jnp.float32),
                  ((0, K_PAD - K_IN), (0, 0))).astype(jnp.bfloat16)
    b1p = b1.astype(jnp.float32).reshape(1, HID)
    w2p = jnp.pad(w2.astype(jnp.float32),
                  ((0, 0), (0, N_PAD - N_OUT))).astype(jnp.bfloat16)
    b2p = jnp.pad(b2.astype(jnp.float32).reshape(1, N_OUT),
                  ((0, 0), (0, N_PAD - N_OUT)))

    grid = (pl.cdiv(B_pad, TB),)

    flops = 2 * B_pad * K_PAD * HID + 2 * B_pad * HID * N_PAD
    bytes_accessed = (x_bf.size * 2 + w1p.size * 2 + w2p.size * 2
                      + b1p.size * 4 + b2p.size * 4 + B_pad * N_PAD * 4)

    out = pl.pallas_call(
        mlp_kernel,
        out_shape=jax.ShapeDtypeStruct((B_pad, N_PAD), jnp.float32),
        grid_spec=pltpu.PrefetchScalarGridSpec(
            num_scalar_prefetch=0,
            grid=grid,
            in_specs=[
                # x tile moves with the batch-grid index (pipelined)
                pl.BlockSpec((TB, K_PAD), lambda i: (i, 0)),
                # weights / biases: constant index -> resident in VMEM
                pl.BlockSpec((K_PAD, HID), lambda i: (0, 0)),
                pl.BlockSpec((1, HID), lambda i: (0, 0)),
                pl.BlockSpec((HID, N_PAD), lambda i: (0, 0)),
                pl.BlockSpec((1, N_PAD), lambda i: (0, 0)),
            ],
            out_specs=pl.BlockSpec((TB, N_PAD), lambda i: (i, 0)),
        ),
        compiler_params=pltpu.CompilerParams(
            dimension_semantics=("parallel",),
        ),
        cost_estimate=pl.CostEstimate(
            flops=flops, transcendentals=0, bytes_accessed=bytes_accessed),
    )(x_bf, w1p, b1p, w2p, b2p)

    return out[:B, :N_OUT]


def init_params(key):
    """Deterministic init mirroring nn.Linear shapes (stored transposed: in x out)."""
    k1, k2, k3, k4 = jax.random.split(key, 4)
    bound1 = 1.0 / (K_IN) ** 0.5
    w1 = jax.random.uniform(k1, (K_IN, HID), jnp.float32, -bound1, bound1)
    b1 = jax.random.uniform(k2, (1, HID), jnp.float32, -bound1, bound1)
    bound2 = 1.0 / HID ** 0.5
    w2 = jax.random.uniform(k3, (HID, N_OUT), jnp.float32, -bound2, bound2)
    b2 = jax.random.uniform(k4, (1, N_OUT), jnp.float32, -bound2, bound2)
    return w1, b1, w2, b2


if __name__ == "__main__":
    key = jax.random.PRNGKey(0)
    kx, kp = jax.random.split(key)
    # small MNIST-like batch: (B=32, C=1, H=28, W=28); tb=16 exercises the
    # batch-tiled grid (2 tiles) with weights resident across grid steps.
    x = jax.random.normal(kx, (32, 1, 28, 28), jnp.float32)
    w1, b1, w2, b2 = init_params(kp)

    out = net_forward(x, w1, b1, w2, b2, tb=16)
    out = jax.block_until_ready(out)

    # --- reference checks -----------------------------------------------
    x2d = x.reshape(-1, K_IN)

    # (a) exact-structure reference using the same bf16-rounded operands
    xb = x2d.astype(jnp.bfloat16).astype(jnp.float32)
    w1b = w1.astype(jnp.bfloat16).astype(jnp.float32)
    w2b = w2.astype(jnp.bfloat16).astype(jnp.float32)
    h_ref = jnp.maximum(xb @ w1b + b1, 0.0)
    ref_bf = h_ref.astype(jnp.bfloat16).astype(jnp.float32) @ w2b + b2

    # (b) full-precision reference (bf16 quantization is the only delta)
    ref_f32 = jnp.maximum(x2d @ w1 + b1, 0.0) @ w2 + b2

    assert out.shape == (32, N_OUT)
    assert jnp.allclose(out, ref_bf, atol=2e-3, rtol=2e-3), (
        float(jnp.max(jnp.abs(out - ref_bf))))
    assert jnp.allclose(out, ref_f32, atol=5e-2, rtol=5e-2), (
        float(jnp.max(jnp.abs(out - ref_f32))))
    print("KERNEL_OK")
</pallas_src>

<mosaic_0001>
module attributes {stable_mosaic.version = 11 : i64} {
  func.func @mlp_kernel(%arg0: i32, %arg1: memref<16x896xbf16, #tpu.memory_space<vmem>>, %arg2: memref<896x256xbf16, #tpu.memory_space<vmem>>, %arg3: memref<1x256xf32, #tpu.memory_space<vmem>>, %arg4: memref<256x128xbf16, #tpu.memory_space<vmem>>, %arg5: memref<1x128xf32, #tpu.memory_space<vmem>>, %arg6: memref<16x128xf32, #tpu.memory_space<vmem>>) attributes {dimension_semantics = [#tpu.dimension_semantics<parallel>], iteration_bounds = array<i64: 2>, scalar_prefetch = 0 : i64, scratch_operands = 0 : i64, tpu.core_type = #tpu.core_type<tc>, window_params = [{transform_indices = @transform_0, window_bounds = array<i64: 16, 896>}, {pipeline_mode = #tpu.pipeline_mode<synchronous>, transform_indices = @transform_1, window_bounds = array<i64: 896, 256>}, {pipeline_mode = #tpu.pipeline_mode<synchronous>, transform_indices = @transform_2, window_bounds = array<i64: 1, 256>}, {pipeline_mode = #tpu.pipeline_mode<synchronous>, transform_indices = @transform_3, window_bounds = array<i64: 256, 128>}, {pipeline_mode = #tpu.pipeline_mode<synchronous>, transform_indices = @transform_4, window_bounds = array<i64: 1, 128>}, {transform_indices = @transform_5, window_bounds = array<i64: 16, 128>}]} {
    %c0 = arith.constant 0 : index
    %c0_0 = arith.constant 0 : index
    %0 = vector.load %arg1[%c0, %c0_0] : memref<16x896xbf16, #tpu.memory_space<vmem>>, vector<16x896xbf16>
    %c0_1 = arith.constant 0 : index
    %c0_2 = arith.constant 0 : index
    %1 = vector.load %arg2[%c0_1, %c0_2] : memref<896x256xbf16, #tpu.memory_space<vmem>>, vector<896x256xbf16>
    %cst = arith.constant dense<0.000000e+00> : vector<16x256xf32>
    %2 = tpu.matmul %0, %1, %cst {dimension_numbers = #tpu.dot_dimension_numbers<[1], [0], [0], [1], [0, 0, 1, 1], [], []>} : vector<16x896xbf16>, vector<896x256xbf16>, vector<16x256xf32> -> vector<16x256xf32>
    %c0_3 = arith.constant 0 : index
    %c0_4 = arith.constant 0 : index
    %3 = vector.load %arg3[%c0_3, %c0_4] : memref<1x256xf32, #tpu.memory_space<vmem>>, vector<1x256xf32>
    %4 = vector.broadcast %3 : vector<1x256xf32> to vector<16x256xf32>
    %5 = arith.addf %2, %4 : vector<16x256xf32>
    %cst_5 = arith.constant 0.000000e+00 : f32
    %6 = vector.broadcast %cst_5 : f32 to vector<16x256xf32>
    %7 = arith.maximumf %5, %6 : vector<16x256xf32>
    %8 = arith.truncf %7 : vector<16x256xf32> to vector<16x256xbf16>
    %c0_6 = arith.constant 0 : index
    %c0_7 = arith.constant 0 : index
    %9 = vector.load %arg4[%c0_6, %c0_7] : memref<256x128xbf16, #tpu.memory_space<vmem>>, vector<256x128xbf16>
    %cst_8 = arith.constant dense<0.000000e+00> : vector<16x128xf32>
    %10 = tpu.matmul %8, %9, %cst_8 {dimension_numbers = #tpu.dot_dimension_numbers<[1], [0], [0], [1], [0, 0, 1, 1], [], []>} : vector<16x256xbf16>, vector<256x128xbf16>, vector<16x128xf32> -> vector<16x128xf32>
    %c0_9 = arith.constant 0 : index
    %c0_10 = arith.constant 0 : index
    %11 = vector.load %arg5[%c0_9, %c0_10] : memref<1x128xf32, #tpu.memory_space<vmem>>, vector<1x128xf32>
    %12 = vector.broadcast %11 : vector<1x128xf32> to vector<16x128xf32>
    %13 = arith.addf %10, %12 : vector<16x128xf32>
    %c0_11 = arith.constant 0 : index
    %c0_12 = arith.constant 0 : index
    %14 = vector.load %arg6[%c0_11, %c0_12] : memref<16x128xf32, #tpu.memory_space<vmem>>, vector<16x128xf32>
    tpu.vector_store %arg6[%c0_11, %c0_12], %13 {strides = array<i32>} : memref<16x128xf32, #tpu.memory_space<vmem>>, vector<16x128xf32>,
    return
  }
  func.func @transform_0(%arg0: i32) -> (i32, i32) {
    %c0_i32 = arith.constant 0 : i32
    %c0_i32_0 = arith.constant 0 : i32
    return %arg0, %c0_i32 : i32, i32
  }
  func.func @transform_1(%arg0: i32) -> (i32, i32) {
    %c0_i32 = arith.constant 0 : i32
    %c0_i32_0 = arith.constant 0 : i32
    %c0_i32_1 = arith.constant 0 : i32
    return %c0_i32, %c0_i32_0 : i32, i32
  }
  func.func @transform_2(%arg0: i32) -> (i32, i32) {
    %c0_i32 = arith.constant 0 : i32
    %c0_i32_0 = arith.constant 0 : i32
    %c0_i32_1 = arith.constant 0 : i32
    return %c0_i32, %c0_i32_0 : i32, i32
  }
  func.func @transform_3(%arg0: i32) -> (i32, i32) {
    %c0_i32 = arith.constant 0 : i32
    %c0_i32_0 = arith.constant 0 : i32
    %c0_i32_1 = arith.constant 0 : i32
    return %c0_i32, %c0_i32_0 : i32, i32
  }
  func.func @transform_4(%arg0: i32) -> (i32, i32) {
    %c0_i32 = arith.constant 0 : i32
    %c0_i32_0 = arith.constant 0 : i32
    %c0_i32_1 = arith.constant 0 : i32
    return %c0_i32, %c0_i32_0 : i32, i32
  }
  func.func @transform_5(%arg0: i32) -> (i32, i32) {
    %c0_i32 = arith.constant 0 : i32
    %c0_i32_0 = arith.constant 0 : i32
    return %arg0, %c0_i32 : i32, i32
  }
}

</mosaic_0001>

<bundles_post_ra>
// kernel: tpu_custom_call.1
= control target key start
LH: loop header
LB: loop body
LE: loop exit
PB: predicated region body
PF: predicated region fallthrough
CT: control target
= control target key end

     0   :  { %10 = vsyncpa [#allocation3], 0  ;;  %s2312_s0 = inlined_call_operand.hbm [shape: bf16[32,896], index: 0, kind: input, shape index: {}]   ;;  %s2313_s1 = inlined_call_operand.hbm [shape: bf16[896,256], index: 1, kind: input, shape index: {}]   ;;  %s2314_s2 = inlined_call_operand.vmem [shape: f32[1,256], index: 2, kind: input, shape index: {}]   ;;  %s2315_s3 = inlined_call_operand.hbm [shape: bf16[256,128], index: 3, kind: input, shape index: {}]   ;;  %s2316_s4 = inlined_call_operand.vmem [shape: f32[1,128], index: 4, kind: input, shape index: {}]   ;;  %s2317_s5 = inlined_call_operand.hbm [shape: f32[32,128], index: 5, kind: output, shape index: {}]  }
   0x1   :  { %12 = vsyncpa [#allocation3 + $0x1], 0 }
   0x2   :  { %13 = vsyncpa [#allocation6], 0 }
   0x3   :  { %14 = vsyncpa [#allocation4], 0 }
   0x4   :  { %16 = vsyncpa [#allocation4 + $0x1], 0  ;;  %s2108_s18 = smov 0   ;;  %s2110_s19 = smov 0  }
   0x5   :  { %s2112_s20 = smov 0   ;;  %s2114_s21 = smov 0  }
   0x6 LB: > { %s2129_s22 = sadd.s32 4294967295, %s2063_s21   ;;  %s1466_s23 = sadd.s32 4294967294, %s2063_s21   ;;  %s2063_s21 = sphi %s2114_s21, %s2339_s21   ;;  %s2059_s20 = sphi %s2112_s20, %s2338_s20   ;;  %s2055_s19 = sphi %s2110_s19, %s2337_s19   ;;  %s2051_s18 = sphi %s2108_s18, %s2336_s18  }
   0x7   : > { %p42_p0 = scmp.ne.s32.totalorder %s2055_s19, %s2051_s18  ;;  %p2318_p1 = scmp.eq.s32.totalorder %s2129_s22, 0 }
   0x8   : > { %p156_p3 = scmp.eq.s32.totalorder %s1466_s23, 1  ;;  %p1467_p5 = scmp.ge.s32.totalorder %s2063_s21, 1 }
   0x9   : > { %p2138_p4 = por %p2318_p1, %p42_p0  ;;  %p163_p7 = scmp.lt.s32.totalorder %s2063_s21, 3 }
   0xa   : > { %p2143_p6 = por %p156_p3, %p42_p0  ;;  %s2065_s27 = smov [#allocation5]  }
   0xb   : > { %s2322_s24 = scalar_select %p2138_p4, 1, 0 }
   0xc   : > { %s2323_s25 = scalar_select %p2143_p6, 1, 0 }
   0xd   : > { %p2148_p8 = pnand %p1467_p5, %p163_p7  ;;  %s175_s28 = sshll.u32 %s2065_s27, 4  ;;  %s176_s28 = int_to_ptr.vmem [resolvable:$true] %s175_s28 }
   0xe   : > { %s2066_s30 = smov [#allocation7]   ;;  %s1926_s7 = scalar_lea.vmem %s176_s28, 14336 }
   0xf   : > { %s2324_s26 = scalar_select %p2148_p8, 1, 0 }
  0x10   : > { %p1657_p9 = pneg %p2148_p8  ;;  %s191_s6 = sshll.u32 %s2066_s30, 4  ;;  %s192_s6 = int_to_ptr.vmem [resolvable:$true] %s191_s6 }
  0x11   : > { %p1927_p13 = scmp.ne.s32.totalorder %s176_s28, %s1926_s7  ;;  %p1934_p5 = scmp.lt.s32.totalorder %s176_s28, %s176_s28 }
  0x12   : > { %p2157_p11 = pnand %p1657_p9, %p2318_p1  ;;  %p1935_p7 = scmp.lt.s32.totalorder %s1926_s7, %s1926_s7 }
  0x14   : > { %p1917_p12 = pneg %p2157_p11  ;;  %p1936_p10 = por %p1935_p7, %p1934_p5 }
  0x16   : > { %p1929_p0 = pnand %p1927_p13, %p1917_p12 }
  0x18   : > { %p1930_p3 = pneg %p1929_p0 }
  0x1a   : > { %p1937_p9 = pnand %p1936_p10, %p1930_p3 }
  0x1c   : > { %1940 = shalt.err (!%p1937_p9)
}
  0x1d   : > { %s2067_s8 = smov 128   ;;  %s2068_s9 = smov 8  }
  0x1e   : > { %1660 = dma.hbm_to_vmem [thread:$0]  (!%p2157_p11), %s2313_s1, 14336, %s176_s28, [#allocation6], %s2067_s8, %s2067_s8, %s2068_s9  }
  0x1f   : > { %s1952_s12 = scalar_lea.vmem %s192_s6, 2048  ;;  %p1960_p2 = scmp.lt.s32.totalorder %s192_s6, %s192_s6 }
  0x20   : > { %p1953_p1 = scmp.ne.s32.totalorder %s192_s6, %s1952_s12  ;;  %p1961_p6 = scmp.lt.s32.totalorder %s1952_s12, %s1952_s12 }
  0x22   : > { %p1955_p13 = pnand %p1953_p1, %p1917_p12  ;;  %p1962_p5 = por %p1961_p6, %p1960_p2 }
  0x24   : > { %p1956_p0 = pneg %p1955_p13 }
  0x26   : > { %p1963_p10 = pnand %p1962_p5, %p1956_p0 }
  0x28   : > { %1966 = shalt.err (!%p1963_p10)
}
  0x29   : > { %s2069_s13 = smov 64   ;;  %s2070_s14 = smov 4  }
  0x2a   : > { %1663 = dma.hbm_to_vmem [thread:$0]  (!%p2157_p11), %s2315_s3, 2048, %s192_s6, [#allocation6], %s2069_s13, %s2069_s13, %s2070_s14  }
  0x2b   : > { %s2180_s17 = sadd.s32 1, %s2063_s21   ;;  %s29_s27 = sadd.s32 1, %s2059_s20 }
  0x2c   : > { %s26_s23 = ssub.s32 %s2063_s21, %s2180_s17  ;;  %p36_p2 = scmp.ne.s32.totalorder %s2059_s20, %s2055_s19 }
  0x2d   : > { %p27_p1 = scmp.eq.s32.totalorder %s26_s23, 0  ;;  %p37_p6 = scmp.eq.s32.totalorder %s2063_s21, 0 }
  0x2e   : > { %p2326_p3 = scmp.eq.s32.totalorder %s2129_s22, 1  ;;  %p1674_p9 = scmp.lt.s32.totalorder %s2063_s21, 2 }
  0x2f   : > { %s2189_s28 = scalar_select %p27_p1, %s2059_s20, %s29_s27  }
  0x30   : > { %p38_p12 = por %p37_p6, %p36_p2  ;;  %p2193_p7 = por %p2326_p3, %p36_p2 }
  0x31   : > { %s208_s29 = sand.u32 1, %s2059_s20   ;;  %s1643_s6 = smul.u32 896, %s2063_s21 }
  0x32   : > { %s2327_s30 = scalar_select %p2193_p7, 1, 0 }
  0x33   : > { %s1642_s7 = smul.u32 56, %s208_s29  ;;  %p2200_p11 = pnand %p1674_p9, %p38_p12 }
  0x34   : > { %s2207_s11 = scalar_lea.hbm %s2312_s0, %s1643_s6  ;;  %s2211_s14 = scalar_lea.sflag [#allocation3], %s208_s29 }
  0x35   : > { %s212_s12 = scalar_lea.vmem [#allocation2], %s1642_s7  ;;  %s1967_s15 = scalar_lea.hbm %s2207_s11, 896 }
  0x36   : > { %s220_s13 = sshll.u32 %s212_s12, 4  ;;  %p1968_p13 = scmp.ne.s32.totalorder %s2207_s11, %s1967_s15  ;;  %s2209_s13 = int_to_ptr.vmem [resolvable:$true] %s220_s13 }
  0x37   : > { %p1969_p0 = pneg %p2200_p11  ;;  %s1972_s27 = scalar_lea.hbm %s2312_s0, 1792 }
  0x38   : > { %p1973_p1 = scmp.lt.s32.totalorder %s2207_s11, %s2312_s0  ;;  %p1974_p2 = scmp.lt.s32.totalorder %s1972_s27, %s1967_s15 }
  0x39   : > { %p1970_p5 = pnand %p1969_p0, %p1968_p13 }
  0x3a   : > { %p1975_p6 = por %p1974_p2, %p1973_p1 }
  0x3b   : > { %p1971_p10 = pneg %p1970_p5 }
  0x3d   : > { %p1976_p12 = pnand %p1975_p6, %p1971_p10 }
  0x3f   : > { %1979 = shalt.err (!%p1976_p12)
}
  0x40   : > { %s1980_s29 = scalar_lea.vmem %s2209_s13, 896  ;;  %s2071_s7 = smov [#allocation2]  }
  0x41   : > { %p1981_p3 = scmp.ne.s32.totalorder %s2209_s13, %s1980_s29  ;;  %s1985_s10 = sshll.u32 %s2071_s7, 4  ;;  %s1986_s10 = int_to_ptr.vmem [resolvable:$false] %s1985_s10 }
  0x42   : > { %s1987_s12 = scalar_lea.vmem %s1986_s10, 1792  ;;  %p1988_p5 = scmp.lt.s32.totalorder %s2209_s13, %s1986_s10 }
  0x43   : > { %p1983_p9 = pnand %p1981_p3, %p1969_p0  ;;  %p1989_p7 = scmp.lt.s32.totalorder %s1987_s12, %s1980_s29 }
  0x45   : > { %p1984_p13 = pneg %p1983_p9  ;;  %p1990_p4 = por %p1989_p7, %p1988_p5 }
  0x47   : > { %p1991_p8 = pnand %p1990_p4, %p1984_p13 }
  0x49   : > { %1994 = shalt.err (!%p1991_p8)
}
  0x4a   : > { %s2072_s15 = smov 448   ;;  %s2073_s16 = smov 28  }
  0x4b   : > { %1667 = dma.hbm_to_vmem [thread:$0]  (!%p2200_p11), %s2207_s11, 896, %s2209_s13, %s2211_s14, %s2072_s15, %s2072_s15, %s2073_s16  }
  0x4c   : > { %p2329_p0 = scmp.ne.s32.totalorder %s2324_s26, 0 }
  0x4d   : > { %s2235_s23 = sand.u32 (!%p2329_p0), 1, %s2055_s19   ;;  %p2330_p4 = scmp.ne.s32.totalorder (!%p2329_p0), %s2322_s24, 0 }
  0x4e   : > { %232 = sbr.rel (%p2329_p0) target bundleno = 641 (0x281), region = 40  ;;  %s235_s6 = scalar_lea.sflag (!%p2329_p0), [#allocation3], %s2235_s23 }
  0x4f   : > { %s1644_s27 = smul.u32 (!%p2329_p0), 56, %s2235_s23 }
  0x51   : > { %s2239_s9 = scalar_lea.vmem (!%p2329_p0), [#allocation2], %s1644_s27 }
  0x53   : > { %2038 = dma.done.wait (%p2330_p4), %s235_s6, 896  }
  0x54   : > { %2040 = vsyncadd (%p2330_p4), %s235_s6, 4294966400  ;;  %p2331_p8 = scmp.eq.s32.totalorder %s2129_s22, 0 }
  0x56   : > { %2042 = dma.done.wait (%p2331_p8), [#allocation6], 16384   ;;  %p2332_p7 = pmov %p2331_p8 }
  0x57   : > { %v1721_v0 = vld [vmem:[#allocation5 + $0x74] ss:$8 sps:$4 sm:$0xff]   ;;  %v1723_v1 = vld [vmem:[#allocation5 + $0x70] ss:$8 sps:$4 sm:$0xff]   ;;  %v1727_v4 = vld [vmem:[#allocation5 + $0x64] ss:$8 sps:$4 sm:$0xff]  }
  0x58   : > { %2044 = vsyncadd (%p2332_p7), [#allocation6], 4294950912  ;;  %1004 = vmatprep.subr.bf16.mxu0 %v1721_v0  ;;  %v1724_v2 = vld [vmem:[#allocation5 + $0x174] ss:$8 sps:$4 sm:$0xff]   ;;  %v1726_v3 = vld [vmem:[#allocation5 + $0x170] ss:$8 sps:$4 sm:$0xff]  }
  0x59   : > { %1005 = vmatpush1.bf16.msra.mxu0 %v1723_v1  ;;  %v1729_v5 = vld [vmem:[#allocation5 + $0x60] ss:$8 sps:$4 sm:$0xff]   ;;  %1047 = vmatprep.subr.bf16.mxu1 %v1724_v2  ;;  %v1730_v6 = vld [vmem:[#allocation5 + $0x164] ss:$8 sps:$4 sm:$0xff]   ;;  %v1733_v8 = vld [vmem:[#allocation5 + $0x54] ss:$8 sps:$4 sm:$0xff]  }
  0x5a   : > { %1048 = vmatpush1.bf16.msra.mxu1 %v1726_v3  ;;  %1006 = vmatprep.subr.bf16.mxu0 %v1727_v4  ;;  %v1732_v7 = vld [vmem:[#allocation5 + $0x160] ss:$8 sps:$4 sm:$0xff]   ;;  %v1735_v9 = vld [vmem:[#allocation5 + $0x50] ss:$8 sps:$4 sm:$0xff]   ;;  %v1736_v10 = vld [vmem:[#allocation5 + $0x154] ss:$8 sps:$4 sm:$0xff]  }
  0x5b   : > { %1049 = vmatprep.subr.bf16.mxu1 %v1730_v6  ;;  %v1739_v11 = vld [vmem:[#allocation5 + $0x44] ss:$8 sps:$4 sm:$0xff]   ;;  %v1738_v12 = vld [vmem:[#allocation5 + $0x150] ss:$8 sps:$4 sm:$0xff]   ;;  %v1741_v14 = vld [vmem:[#allocation5 + $0x40] ss:$8 sps:$4 sm:$0xff]  }
  0x5c   : > { %v1742_v13 = vld [vmem:[#allocation5 + $0x144] ss:$8 sps:$4 sm:$0xff]   ;;  %v1745_v15 = vld [vmem:[#allocation5 + $0x34] ss:$8 sps:$4 sm:$0xff]   ;;  %v1744_v16 = vld [vmem:[#allocation5 + $0x140] ss:$8 sps:$4 sm:$0xff]  }
  0x5d   : > { %1007 = vmatpush1.bf16.msra.mxu0 %v1729_v5  ;;  %v1748_v17 = vld [vmem:[#allocation5 + $0x134] ss:$8 sps:$4 sm:$0xff]   ;;  %v1747_v18 = vld [vmem:[#allocation5 + $0x30] ss:$8 sps:$4 sm:$0xff]   ;;  %v1751_v19 = vld [vmem:[#allocation5 + $0x24] ss:$8 sps:$4 sm:$0xff]  }
  0x5e   : > { %1008 = vmatprep.subr.bf16.mxu0 %v1733_v8  ;;  %1050 = vmatpush1.bf16.msra.mxu1 %v1732_v7  ;;  %v1750_v20 = vld [vmem:[#allocation5 + $0x130] ss:$8 sps:$4 sm:$0xff]   ;;  %v1754_v21 = vld [vmem:[#allocation5 + $0x124] ss:$8 sps:$4 sm:$0xff]   ;;  %v1753_v22 = vld [vmem:[#allocation5 + $0x20] ss:$8 sps:$4 sm:$0xff]  }
  0x5f   : > { %1051 = vmatprep.subr.bf16.mxu1 %v1736_v10  ;;  %v1757_v23 = vld [vmem:[#allocation5 + $0x14] ss:$8 sps:$4 sm:$0xff]   ;;  %v1756_v24 = vld [vmem:[#allocation5 + $0x120] ss:$8 sps:$4 sm:$0xff]   ;;  %v1759_v26 = vld [vmem:[#allocation5 + $0x10] ss:$8 sps:$4 sm:$0xff]  }
  0x60   : > { %v1760_v25 = vld [vmem:[#allocation5 + $0x114] ss:$8 sps:$4 sm:$0xff]   ;;  %v1763_v27 = vld [vmem:[#allocation5 + $0x4] ss:$8 sps:$4 sm:$0xff]   ;;  %v1762_v28 = vld [vmem:[#allocation5 + $0x110] ss:$8 sps:$4 sm:$0xff]  }
  0x61   : > { %1009 = vmatpush1.bf16.msra.mxu0 %v1735_v9  ;;  %v1766_v29 = vld [vmem:[#allocation5 + $0x104] ss:$8 sps:$4 sm:$0xff]   ;;  %v1765_v30 = vld [vmem:[#allocation5] ss:$8 sps:$4 sm:$0xff]   ;;  %v1769_v31 = vld [vmem:[#allocation5 + $0xf4] ss:$8 sps:$4 sm:$0xff]  }
  0x62   : > { %1010 = vmatprep.subr.bf16.mxu0 %v1739_v11  ;;  %1052 = vmatpush1.bf16.msra.mxu1 %v1738_v12  ;;  %v1768_v32 = vld [vmem:[#allocation5 + $0x100] ss:$8 sps:$4 sm:$0xff]   ;;  %v1772_v33 = vld [vmem:[#allocation5 + $0x1f4] ss:$8 sps:$4 sm:$0xff]   ;;  %v1771_v34 = vld [vmem:[#allocation5 + $0xf0] ss:$8 sps:$4 sm:$0xff]  }
  0x63   : > { %1053 = vmatprep.subr.bf16.mxu1 %v1742_v13  ;;  %v1775_v35 = vld [vmem:[#allocation5 + $0xe4] ss:$8 sps:$4 sm:$0xff]   ;;  %v1774_v36 = vld [vmem:[#allocation5 + $0x1f0] ss:$8 sps:$4 sm:$0xff]   ;;  %v1777_v38 = vld [vmem:[#allocation5 + $0xe0] ss:$8 sps:$4 sm:$0xff]  }
  0x64   : > { %v1778_v37 = vld [vmem:[#allocation5 + $0x1e4] ss:$8 sps:$4 sm:$0xff]   ;;  %v1781_v39 = vld [vmem:[#allocation5 + $0xd4] ss:$8 sps:$4 sm:$0xff]   ;;  %v1780_v40 = vld [vmem:[#allocation5 + $0x1e0] ss:$8 sps:$4 sm:$0xff]  }
  0x65   : > { %1011 = vmatpush1.bf16.msra.mxu0 %v1741_v14  ;;  %v1784_v41 = vld [vmem:[#allocation5 + $0x1d4] ss:$8 sps:$4 sm:$0xff]   ;;  %v1783_v42 = vld [vmem:[#allocation5 + $0xd0] ss:$8 sps:$4 sm:$0xff]   ;;  %v1787_v43 = vld [vmem:[#allocation5 + $0xc4] ss:$8 sps:$4 sm:$0xff]  }
  0x66   : > { %1012 = vmatprep.subr.bf16.mxu0 %v1745_v15  ;;  %1054 = vmatpush1.bf16.msra.mxu1 %v1744_v16  ;;  %v1786_v44 = vld [vmem:[#allocation5 + $0x1d0] ss:$8 sps:$4 sm:$0xff]   ;;  %v1790_v45 = vld [vmem:[#allocation5 + $0x1c4] ss:$8 sps:$4 sm:$0xff]   ;;  %v1789_v46 = vld [vmem:[#allocation5 + $0xc0] ss:$8 sps:$4 sm:$0xff]  }
  0x67   : > { %1055 = vmatprep.subr.bf16.mxu1 %v1748_v17  ;;  %v1818_v47 = vld [vmem:[%s2239_s9 + $0x4] ss:$28 sps:$4 sm:$0xff]   ;;  %v1825_v51 = vld [vmem:[%s2239_s9 + $0xc] ss:$28 sps:$4 sm:$0xff]   ;;  %v2074_v13 = vmov 0   ;;  %s1477_s8 = sshll.u32 %s2235_s23, 4 }
  0x68   : > { %v1793_v48 = vld [vmem:[#allocation5 + $0xb4] ss:$8 sps:$4 sm:$0xff]   ;;  %v1792_v49 = vld [vmem:[#allocation5 + $0x1c0] ss:$8 sps:$4 sm:$0xff]   ;;  %1036 = vmatprep.mubr.bf16.mxu0 %v1818_v47  ;;  %v1795_v52 = vld [vmem:[#allocation5 + $0xb0] ss:$8 sps:$4 sm:$0xff]   ;;  %1079 = vmatprep.mubr.bf16.mxu1 %v1825_v51 }
  0x69   : > { %1013 = vmatpush1.bf16.msra.mxu0 %v1747_v18  ;;  %v1796_v50 = vld [vmem:[#allocation5 + $0x1b4] ss:$8 sps:$4 sm:$0xff]   ;;  %v1799_v53 = vld [vmem:[#allocation5 + $0xa4] ss:$8 sps:$4 sm:$0xff]   ;;  %v1798_v54 = vld [vmem:[#allocation5 + $0x1b0] ss:$8 sps:$4 sm:$0xff]  }
  0x6a   : > { %1014 = vmatprep.subr.bf16.mxu0 %v1751_v19  ;;  %1056 = vmatpush1.bf16.msra.mxu1 %v1750_v20  ;;  %v1802_v55 = vld [vmem:[#allocation5 + $0x1a4] ss:$8 sps:$4 sm:$0xff]   ;;  %v1801_v56 = vld [vmem:[#allocation5 + $0xa0] ss:$8 sps:$4 sm:$0xff]   ;;  %v1805_v57 = vld [vmem:[#allocation5 + $0x94] ss:$8 sps:$4 sm:$0xff]  }
  0x6b   : > { %1057 = vmatprep.subr.bf16.mxu1 %v1754_v21  ;;  %v1804_v58 = vld [vmem:[#allocation5 + $0x1a0] ss:$8 sps:$4 sm:$0xff]   ;;  %v1808_v59 = vld [vmem:[#allocation5 + $0x194] ss:$8 sps:$4 sm:$0xff]   ;;  %v1807_v60 = vld [vmem:[#allocation5 + $0x90] ss:$8 sps:$4 sm:$0xff]  }
  0x6c   : > { %v1811_v61 = vld [vmem:[#allocation5 + $0x84] ss:$8 sps:$4 sm:$0xff]   ;;  %v1810_v62 = vld [vmem:[#allocation5 + $0x190] ss:$8 sps:$4 sm:$0xff]   ;;  %v1813_v0 = vld [vmem:[#allocation5 + $0x80] ss:$8 sps:$4 sm:$0xff]  }
  0x6d   : > { %1015 = vmatpush1.bf16.msra.mxu0 %v1753_v22  ;;  %v1814_v63 = vld [vmem:[#allocation5 + $0x184] ss:$8 sps:$4 sm:$0xff]   ;;  %v1822_v1 = vld [vmem:[#allocation5 + $0x274] ss:$8 sps:$4 sm:$0xff]   ;;  %v1819_v2 = vld [vmem:[#allocation5 + $0x180] ss:$8 sps:$4 sm:$0xff]  }
  0x6e   : > { %1016 = vmatprep.subr.bf16.mxu0 %v1757_v23  ;;  %1058 = vmatpush1.bf16.msra.mxu1 %v1756_v24  ;;  %v1816_v3 = vld [vmem:[%s2239_s9] ss:$28 sps:$4 sm:$0xff]   ;;  %v1849_v4 = vld [vmem:[#allocation5 + $0x374] ss:$8 sps:$4 sm:$0xff]   ;;  %s272_s14 = scalar_lea.vmem [#allocation8], %s1477_s8  ;;  %s1619_s7 = sshll.u32 %s2129_s22, 8 }
  0x6f   : > { %1059 = vmatprep.subr.bf16.mxu1 %v1760_v25  ;;  %v1820_v5 = vld [vmem:[#allocation5 + $0x270] ss:$8 sps:$4 sm:$0xff]   ;;  %v1828_v7 = vld [vmem:[#allocation5 + $0x264] ss:$8 sps:$4 sm:$0xff]   ;;  %v1826_v10 = vld [vmem:[#allocation5 + $0x260] ss:$8 sps:$4 sm:$0xff]   ;;  %s2269_s15 = scalar_lea.hbm %s2317_s5, %s1619_s7 }
  0x70   : > { %v1823_v6 = vld [vmem:[%s2239_s9 + $0x8] ss:$28 sps:$4 sm:$0xff]   ;;  %v1853_v12 = vld [vmem:[#allocation5 + $0x360] ss:$8 sps:$4 sm:$0xff]   ;;  %s1374_s29 = sshll.u32 %s272_s14, 4  ;;  %s1361_s16 = scalar_lea.sflag [#allocation4], %s2235_s23  ;;  %s2264_s29 = int_to_ptr.vmem [resolvable:$true] %s1374_s29 }
  0x71   : > { %1017 = vmatpush1.bf16.msra.mxu0 %v1759_v26  ;;  %v1847_v8 = vld [vmem:[#allocation5 + $0x370] ss:$8 sps:$4 sm:$0xff]   ;;  %v1855_v9 = vld [vmem:[#allocation5 + $0x364] ss:$8 sps:$4 sm:$0xff]   ;;  %v1831_v11 = vld [vmem:[#allocation5 + $0x254] ss:$8 sps:$4 sm:$0xff]  }
  0x72   : > { %1018 = vmatprep.subr.bf16.mxu0 %v1763_v27  ;;  %1060 = vmatpush1.bf16.msra.mxu1 %v1762_v28  ;;  %v1861_v14 = vld [vmem:[#allocation5 + $0x354] ss:$8 sps:$4 sm:$0xff]   ;;  %v1829_v15 = vld [vmem:[#allocation5 + $0x250] ss:$8 sps:$4 sm:$0xff]   ;;  %v1834_v16 = vld [vmem:[#allocation5 + $0x244] ss:$8 sps:$4 sm:$0xff]  }
  0x73   : > { %1061 = vmatprep.subr.bf16.mxu1 %v1766_v29  ;;  %v1859_v17 = vld [vmem:[#allocation5 + $0x350] ss:$8 sps:$4 sm:$0xff]   ;;  %v1867_v18 = vld [vmem:[#allocation5 + $0x344] ss:$8 sps:$4 sm:$0xff]   ;;  %v1832_v19 = vld [vmem:[#allocation5 + $0x240] ss:$8 sps:$4 sm:$0xff]  }
  0x74   : > { %v1837_v20 = vld [vmem:[#allocation5 + $0x234] ss:$8 sps:$4 sm:$0xff]   ;;  %v1835_v21 = vld [vmem:[#allocation5 + $0x230] ss:$8 sps:$4 sm:$0xff]   ;;  %v1865_v22 = vld [vmem:[#allocation5 + $0x340] ss:$8 sps:$4 sm:$0xff]  }
  0x75   : > { %1019 = vmatpush1.bf16.msra.mxu0 %v1765_v30  ;;  %v1873_v23 = vld [vmem:[#allocation5 + $0x334] ss:$8 sps:$4 sm:$0xff]   ;;  %v1840_v24 = vld [vmem:[#allocation5 + $0x224] ss:$8 sps:$4 sm:$0xff]   ;;  %v1871_v25 = vld [vmem:[#allocation5 + $0x330] ss:$8 sps:$4 sm:$0xff]  }
  0x76   : > { %1020 = vmatprep.subr.bf16.mxu0 %v1769_v31  ;;  %1062 = vmatpush1.bf16.msra.mxu1 %v1768_v32  ;;  %v1898_v26 = vld [vmem:[%s2239_s9 + $0x14] ss:$28 sps:$4 sm:$0xff]   ;;  %s1995_s27 = scalar_lea.vmem %s2264_s29, 256  ;;  %p2333_p10 = scmp.ne.s32.totalorder %s2327_s30, 0 }
  0x77   : > { %1063 = vmatprep.subr.bf16.mxu1 %v1772_v33  ;;  %v1879_v27 = vld [vmem:[#allocation5 + $0x324] ss:$8 sps:$4 sm:$0xff]   ;;  %v1838_v28 = vld [vmem:[#allocation5 + $0x220] ss:$8 sps:$4 sm:$0xff]   ;;  %v1843_v29 = vld [vmem:[#allocation5 + $0x214] ss:$8 sps:$4 sm:$0xff]   ;;  %p1996_p11 = scmp.ne.s32.totalorder %s2264_s29, %s1995_s27 }
  0x78   : > { %v1877_v30 = vld [vmem:[#allocation5 + $0x320] ss:$8 sps:$4 sm:$0xff]   ;;  %v1885_v31 = vld [vmem:[#allocation5 + $0x314] ss:$8 sps:$4 sm:$0xff]   ;;  %v1841_v32 = vld [vmem:[#allocation5 + $0x210] ss:$8 sps:$4 sm:$0xff]  }
  0x79   : > { %1021 = vmatpush2.bf16.msra.mxu0 %v1771_v34  ;;  %v1846_v33 = vld [vmem:[#allocation5 + $0x204] ss:$8 sps:$4 sm:$0xff]   ;;  %v1883_v34 = vld [vmem:[#allocation5 + $0x310] ss:$8 sps:$4 sm:$0xff]   ;;  %v1876_v47 = vld [vmem:[#allocation5 + $0x2b4] ss:$8 sps:$4 sm:$0xff]   ;;  %p1997_p1 = pnand %p1996_p11, %p2333_p10 }
  0x7a   : > { %1022 = vmatprep.subr.bf16.mxu0 %v1775_v35  ;;  %1064 = vmatpush2.bf16.msra.mxu1 %v1774_v36  ;;  %v1891_v35 = vld [vmem:[#allocation5 + $0x304] ss:$8 sps:$4 sm:$0xff]   ;;  %v1844_v36 = vld [vmem:[#allocation5 + $0x200] ss:$8 sps:$4 sm:$0xff]   ;;  %v1888_v51 = vld [vmem:[#allocation5 + $0x294] ss:$8 sps:$4 sm:$0xff]  }
  0x7b   : > { %1065 = vmatprep.subr.bf16.mxu1 %v1778_v37  ;;  %v1852_v37 = vld [vmem:[#allocation5 + $0x2f4] ss:$8 sps:$4 sm:$0xff]   ;;  %p1998_p2 = pneg %p1997_p1  ;;  %s2075_s22 = smov [#allocation8]  }
  0x7c   : > { %s1999_s6 = sshll.u32 %s2075_s22, 4  ;;  %s2000_s6 = int_to_ptr.vmem [resolvable:$false] %s1999_s6 }
  0x7d   : > { %1023 = vmatpush2.bf16.msra.mxu0 %v1777_v38  ;;  %v1889_v38 = vld [vmem:[#allocation5 + $0x300] ss:$8 sps:$4 sm:$0xff]   ;;  %p2002_p6 = scmp.lt.s32.totalorder %s2264_s29, %s2000_s6 }
  0x7e   : > { %1024 = vmatprep.subr.bf16.mxu0 %v1781_v39  ;;  %1066 = vmatpush2.bf16.msra.mxu1 %v1780_v40  ;;  %v1850_v39 = vld [vmem:[#allocation5 + $0x2f0] ss:$8 sps:$4 sm:$0xff]   ;;  %v1858_v40 = vld [vmem:[#allocation5 + $0x2e4] ss:$8 sps:$4 sm:$0xff]  }
  0x7f   : > { %1067 = vmatprep.subr.bf16.mxu1 %v1784_v41  ;;  %v1895_v41 = vld [vmem:[%s2239_s9 + $0x18] ss:$28 sps:$4 sm:$0xff]  }
  0x81   : > { %1025 = vmatpush2.bf16.msra.mxu0 %v1783_v42  ;;  %v1856_v42 = vld [vmem:[#allocation5 + $0x2e0] ss:$8 sps:$4 sm:$0xff]  }
  0x82   : > { %1026 = vmatprep.subr.bf16.mxu0 %v1787_v43  ;;  %1068 = vmatpush2.bf16.msra.mxu1 %v1786_v44  ;;  %v1864_v43 = vld [vmem:[#allocation5 + $0x2d4] ss:$8 sps:$4 sm:$0xff]   ;;  %v1862_v44 = vld [vmem:[#allocation5 + $0x2d0] ss:$8 sps:$4 sm:$0xff]  }
  0x83   : > { %1069 = vmatprep.subr.bf16.mxu1 %v1790_v45  ;;  %v1870_v45 = vld [vmem:[#allocation5 + $0x2c4] ss:$8 sps:$4 sm:$0xff]  }
  0x85   : > { %1027 = vmatpush2.bf16.msra.mxu0 %v1789_v46  ;;  %v1868_v46 = vld [vmem:[#allocation5 + $0x2c0] ss:$8 sps:$4 sm:$0xff]  }
  0x86   : > { %1028 = vmatprep.subr.bf16.mxu0 %v1793_v48  ;;  %1070 = vmatpush2.bf16.msra.mxu1 %v1792_v49  ;;  %v1874_v48 = vld [vmem:[#allocation5 + $0x2b0] ss:$8 sps:$4 sm:$0xff]   ;;  %v1882_v49 = vld [vmem:[#allocation5 + $0x2a4] ss:$8 sps:$4 sm:$0xff]  }
  0x87   : > { %1071 = vmatprep.subr.bf16.mxu1 %v1796_v50  ;;  %v1880_v50 = vld [vmem:[#allocation5 + $0x2a0] ss:$8 sps:$4 sm:$0xff]  }
  0x89   : > { %1029 = vmatpush2.bf16.msra.mxu0 %v1795_v52  ;;  %v1886_v52 = vld [vmem:[#allocation5 + $0x290] ss:$8 sps:$4 sm:$0xff]  }
  0x8a   : > { %1030 = vmatprep.subr.bf16.mxu0 %v1799_v53  ;;  %1072 = vmatpush2.bf16.msra.mxu1 %v1798_v54  ;;  %v1894_v53 = vld [vmem:[#allocation5 + $0x284] ss:$8 sps:$4 sm:$0xff]   ;;  %v1892_v54 = vld [vmem:[#allocation5 + $0x280] ss:$8 sps:$4 sm:$0xff]  }
  0x8b   : > { %1073 = vmatprep.subr.bf16.mxu1 %v1802_v55  ;;  %v1896_v55 = vld [vmem:[%s2239_s9 + $0x10] ss:$28 sps:$4 sm:$0xff]   ;;  %s2001_s9 = scalar_lea.vmem %s2000_s6, 512 }
  0x8c   : > { %p2003_p12 = scmp.lt.s32.totalorder %s2001_s9, %s1995_s27 }
  0x8d   : > { %1031 = vmatpush2.bf16.msra.mxu0 %v1801_v56  ;;  %v1899_v56 = vld [vmem:[#allocation7 + $0x78] sm:$0xff]  }
  0x8e   : > { %1032 = vmatprep.subr.bf16.mxu0 %v1805_v57  ;;  %1074 = vmatpush2.bf16.msra.mxu1 %v1804_v58  ;;  %v1900_v57 = vld [vmem:[#allocation7 + $0x38] sm:$0xff]   ;;  %v1901_v58 = vld [vmem:[#allocation7 + $0x70] sm:$0xff]   ;;  %p2004_p3 = por %p2003_p12, %p2002_p6 }
  0x8f   : > { %1075 = vmatprep.subr.bf16.mxu1 %v1808_v59  ;;  %v1902_v59 = vld [vmem:[#allocation7 + $0x30] sm:$0xff]  }
  0x90   : > { %p2005_p9 = pnand %p2004_p3, %p1998_p2 }
  0x91   : > { %1033 = vmatpush2.bf16.msra.mxu0 %v1807_v60  ;;  %v1903_v60 = vld [vmem:[#allocation7 + $0x68] sm:$0xff]  }
  0x92   : > { %1034 = vmatprep.subr.bf16.mxu0 %v1811_v61  ;;  %1076 = vmatpush2.bf16.msra.mxu1 %v1810_v62  ;;  %v1904_v61 = vld [vmem:[#allocation7 + $0x28] sm:$0xff]   ;;  %v1905_v62 = vld [vmem:[#allocation7 + $0x60] sm:$0xff]  }
  0x93   : > { %1077 = vmatprep.subr.bf16.mxu1 %v1814_v63  ;;  %v1906_v63 = vld [vmem:[#allocation7 + $0x20] sm:$0xff]  }
  0x95   : > { %1035 = vmatpush2.bf16.msra.mxu0 %v1813_v0  ;;  %v1907_v0 = vld [vmem:[#allocation7 + $0x58] sm:$0xff]  }
  0x96   : > { %1090 = vmatprep.subr.bf16.mxu0 %v1822_v1  ;;  %1078 = vmatpush2.bf16.msra.mxu1 %v1819_v2  ;;  %v1908_v1 = vld [vmem:[#allocation7 + $0x18] sm:$0xff]   ;;  %v1909_v2 = vld [vmem:[#allocation7 + $0x50] sm:$0xff]  }
  0x97   : > { %1133 = vmatprep.subr.bf16.mxu1 %v1849_v4  ;;  %v1911_v4 = vld [vmem:[#allocation7 + $0x48] sm:$0xff]  }
  0x98   : > { %1037 = vmatmul.mubr.bf16.vlgmr.msra.gmra.mxu0 %v1816_v3  ;;  %v1910_v3 = vld [vmem:[#allocation7 + $0x10] sm:$0xff]  }
  0x99   : > { %1091 = vmatpush1.bf16.msra.mxu0 %v1820_v5  ;;  %1080 = vmatmul.mubr.bf16.vlgmr.msra.gmra.mxu1 %v1823_v6  ;;  %v1912_v5 = vld [vmem:[#allocation7 + $0x8] sm:$0xff]   ;;  %v1913_v6 = vld [vmem:[#allocation7 + $0x40] sm:$0xff]  }
  0x9a   : > { %1092 = vmatprep.subr.bf16.mxu0 %v1828_v7  ;;  %1134 = vmatpush1.bf16.msra.mxu1 %v1847_v8  ;;  %v1914_v7 = vld [vmem:[#allocation7] sm:$0xff]   ;;  %v398_v8 = vlaneseq }
  0x9b   : > { %1165 = vmatprep.mubr.bf16.mxu1 %v2074_v13  ;;  %1135 = vmatprep.subr.bf16.mxu1 %v1855_v9 }
  0x9c   : > { %1122 = vmatprep.mubr.bf16.mxu0 %v1898_v26 }
  0x9d   : > { %1093 = vmatpush1.bf16.msra.mxu0 %v1826_v10  ;;  %v399_v10 = vshrl.u32 %v398_v8, 7 }
  0x9e   : > { %1094 = vmatprep.subr.bf16.mxu0 %v1831_v11  ;;  %1136 = vmatpush1.bf16.msra.mxu1 %v1853_v12 }
  0x9f   : > { %1137 = vmatprep.subr.bf16.mxu1 %v1861_v14  ;;  %v404_v13 = vsub.s32 1, %v399_v10  ;;  %v396_v14 = vld [vmem:[%s2314_s2] sm:$0x3] }
  0xa1   : > { %1095 = vmatpush1.bf16.msra.mxu0 %v1829_v15  ;;  %v400_v15 = vsub.s32 0, %v399_v10 }
  0xa2   : > { %1096 = vmatprep.subr.bf16.mxu0 %v1834_v16  ;;  %1138 = vmatpush1.bf16.msra.mxu1 %v1859_v17 }
  0xa3   : > { %1139 = vmatprep.subr.bf16.mxu1 %v1867_v18  ;;  %v405_v18 = vrot.slane %v396_v14, %v404_v13 }
  0xa5   : > { %1097 = vmatpush1.bf16.msra.mxu0 %v1832_v19  ;;  %v401_v19 = vrot.slane %v396_v14, %v400_v15 }
  0xa6   : > { %1098 = vmatprep.subr.bf16.mxu0 %v1837_v20  ;;  %1140 = vmatpush1.bf16.msra.mxu1 %v1865_v22 }
  0xa7   : > { %1141 = vmatprep.subr.bf16.mxu1 %v1873_v23 }
  0xa9   : > { %1099 = vmatpush1.bf16.msra.mxu0 %v1835_v21 }
  0xaa   : > { %1100 = vmatprep.subr.bf16.mxu0 %v1840_v24  ;;  %1142 = vmatpush1.bf16.msra.mxu1 %v1871_v25 }
  0xab   : > { %1143 = vmatprep.subr.bf16.mxu1 %v1879_v27 }
  0xad   : > { %1101 = vmatpush1.bf16.msra.mxu0 %v1838_v28 }
  0xae   : > { %1102 = vmatprep.subr.bf16.mxu0 %v1843_v29  ;;  %1144 = vmatpush1.bf16.msra.mxu1 %v1877_v30 }
  0xaf   : > { %1145 = vmatprep.subr.bf16.mxu1 %v1885_v31 }
  0xb1   : > { %1103 = vmatpush1.bf16.msra.mxu0 %v1841_v32 }
  0xb2   : > { %1104 = vmatprep.subr.bf16.mxu0 %v1846_v33  ;;  %1146 = vmatpush1.bf16.msra.mxu1 %v1883_v34 }
  0xb3   : > { %1147 = vmatprep.subr.bf16.mxu1 %v1891_v35 }
  0xb5   : > { %1105 = vmatpush1.bf16.msra.mxu0 %v1844_v36 }
  0xb6   : > { %1106 = vmatprep.subr.bf16.mxu0 %v1852_v37  ;;  %1148 = vmatpush1.bf16.msra.mxu1 %v1889_v38 }
  0xb7   : > { %1620 = vmatprep.subr.bf16.mxu1 %v1899_v56 }
  0xb9   : > { %1107 = vmatpush2.bf16.msra.mxu0 %v1850_v39  ;;  %1166 = vmatmul.mubr.bf16.vlgmr.msra.gmra.mxu1 %v1895_v41 }
  0xba   : > { %1108 = vmatprep.subr.bf16.mxu0 %v1858_v40  ;;  %1621 = vmatpush3.bf16.msra.mxu1 %v1900_v57 }
  0xbb   : > { %1622 = vmatprep.subr.bf16.mxu1 %v1901_v58 }
  0xbd   : > { %1109 = vmatpush2.bf16.msra.mxu0 %v1856_v42 }
  0xbe   : > { %1110 = vmatprep.subr.bf16.mxu0 %v1864_v43  ;;  %1623 = vmatpush3.bf16.msra.mxu1 %v1902_v59 }
  0xbf   : > { %1624 = vmatprep.subr.bf16.mxu1 %v1903_v60 }
  0xc1   : > { %1111 = vmatpush2.bf16.msra.mxu0 %v1862_v44 }
  0xc2   : > { %1112 = vmatprep.subr.bf16.mxu0 %v1870_v45  ;;  %1625 = vmatpush3.bf16.msra.mxu1 %v1904_v61 }
  0xc3   : > { %1626 = vmatprep.subr.bf16.mxu1 %v1905_v62 }
  0xc5   : > { %1113 = vmatpush2.bf16.msra.mxu0 %v1868_v46 }
  0xc6   : > { %1114 = vmatprep.subr.bf16.mxu0 %v1876_v47  ;;  %1627 = vmatpush3.bf16.msra.mxu1 %v1906_v63 }
  0xc7   : > { %1628 = vmatprep.subr.bf16.mxu1 %v1907_v0 }
  0xc9   : > { %1115 = vmatpush2.bf16.msra.mxu0 %v1874_v48 }
  0xca   : > { %1116 = vmatprep.subr.bf16.mxu0 %v1882_v49  ;;  %1629 = vmatpush3.bf16.msra.mxu1 %v1908_v1 }
  0xcb   : > { %1630 = vmatprep.subr.bf16.mxu1 %v1909_v2 }
  0xcd   : > { %1117 = vmatpush2.bf16.msra.mxu0 %v1880_v50 }
  0xce   : > { %1118 = vmatprep.subr.bf16.mxu0 %v1888_v51  ;;  %1631 = vmatpush3.bf16.msra.mxu1 %v1910_v3 }
  0xcf   : > { %1632 = vmatprep.subr.bf16.mxu1 %v1911_v4 }
  0xd1   : > { %1119 = vmatpush2.bf16.msra.mxu0 %v1886_v52 }
  0xd2   : > { %1120 = vmatprep.subr.bf16.mxu0 %v1894_v53  ;;  %1633 = vmatpush3.bf16.msra.mxu1 %v1912_v5 }
  0xd3   : > { %1634 = vmatprep.subr.bf16.mxu1 %v1913_v6 }
  0xd5   : > { %1121 = vmatpush2.bf16.msra.mxu0 %v1892_v54  ;;  %v1597_v54 = vld [vmem:[%s2316_s4] ss:$0 sm:$0xff] }
  0xd6   : > { %1635 = vmatpush3.bf16.msra.mxu1 %v1914_v7 }
  0xd8   : > { %1123 = vmatmul.mubr.bf16.vlgmr.msra.gmra.mxu0 %v1896_v55 }
 0x158   : > { %v1038_v11 = vpop.f32.mrf.mxu0 }
 0x159   : > { %v1081_v9 = vpop.f32.mrf.mxu1  ;;  %v1039_v24 = vadd.f32 %v1038_v11, %v401_v19 }
 0x15a   : > { %v1040_v16 = vpop.f32.mrf.mxu0 }
 0x15b   : > { %v1083_v12 = vpop.f32.mrf.mxu1  ;;  %v1041_v23 = vadd.f32 %v1040_v16, %v405_v18  ;;  %v1082_v31 = vadd.f32 %v1081_v9, %v1039_v24 }
 0x15c   : > { %v1042_v20 = vpop.f32.mrf.mxu0 }
 0x15d   : > { %v1085_v17 = vpop.f32.mrf.mxu1  ;;  %v1043_v26 = vadd.f32 %v1042_v20, %v401_v19  ;;  %v1084_v29 = vadd.f32 %v1083_v12, %v1041_v23 }
 0x15e   : > { %v1044_v25 = vpop.f32.mrf.mxu0 }
 0x15f   : > { %v1087_v21 = vpop.f32.mrf.mxu1  ;;  %v1045_v30 = vadd.f32 %v1044_v25, %v405_v18  ;;  %v1086_v33 = vadd.f32 %v1085_v17, %v1043_v26 }
 0x161   : > { %v1088_v38 = vadd.f32 %v1087_v21, %v1045_v30 }
 0x179   : > { %v1167_v22 = vpop.f32.mrf.mxu1 }
 0x17b   : > { %v1169_v27 = vpop.f32.mrf.mxu1 }
 0x17d   : > { %v1171_v36 = vpop.f32.mrf.mxu1 }
 0x17f   : > { %v1173_v45 = vpop.f32.mrf.mxu1 }
 0x198   : > { %v1124_v28 = vpop.f32.mrf.mxu0 }
 0x199   : > { %v1125_v35 = vadd.f32 %v1124_v28, %v1082_v31 }
 0x19a   : > { %v1126_v32 = vpop.f32.mrf.mxu0 }
 0x19b   : > { %v1127_v34 = vadd.f32 %v1126_v32, %v1084_v29  ;;  %v1168_v44 = vadd.f32 %v1167_v22, %v1125_v35 }
 0x19c   : > { %v1128_v37 = vpop.f32.mrf.mxu0 }
 0x19d   : > { %v1129_v39 = vadd.f32 %v1128_v37, %v1086_v33  ;;  %v1170_v41 = vadd.f32 %v1169_v27, %v1127_v34  ;;  %v1176_v50 = vmax.f32 %v1168_v44, 0.0 }
 0x19e   : > { %v1130_v40 = vpop.f32.mrf.mxu0 }
 0x19f   : > { %v1172_v42 = vadd.f32 %v1171_v36, %v1129_v39  ;;  %v1131_v43 = vadd.f32 %v1130_v40, %v1088_v38  ;;  %v1177_v48 = vmax.f32 %v1170_v41, 0.0 }
 0x1a1   : > { %v1174_v46 = vadd.f32 %v1173_v45, %v1131_v43  ;;  %v1178_v47 = vmax.f32 %v1172_v42, 0.0 }
 0x1a3   : > { %v1179_v49 = vmax.f32 %v1174_v46, 0.0  ;;  %v1180_v52 = vpack.c.bf16 %v1178_v47, %v1176_v50 }
 0x1a5   : > { %v1181_v51 = vpack.c.bf16 %v1179_v49, %v1177_v48 }
 0x1a7   : > { %1349 = vmatprep.mubr.bf16.mxu1 %v1181_v51 }
 0x1a8   : > { %1350 = vmatmul.mubr.bf16.vlgmr.msra.gmra.mxu1 %v1180_v52 }
 0x268   : > { %v1636_v53 = vpop.f32.mrf.mxu1 }
 0x26a   : > { %v1637_v55 = vpop.f32.mrf.mxu1 }
 0x26b   : > { %v1638_v56 = vadd.f32 %v1637_v55, %v1636_v53 }
 0x26c   : > { %v1639_v57 = vpop.f32.mrf.mxu1 }
 0x26d   : > { %v1352_v58 = vadd.f32 %v1638_v56, %v1597_v54 }
 0x26e   : > { %v1640_v59 = vpop.f32.mrf.mxu1 }
 0x26f   : > { %1358 = vst [vmem:[%s272_s14] sm:$0xff] %v1352_v58  ;;  %v1641_v60 = vadd.f32 %v1640_v59, %v1639_v57 }
 0x271   : > { %v1355_v61 = vadd.f32 %v1641_v60, %v1597_v54 }
 0x273   : > { %1359 = vst [vmem:[%s272_s14 + $0x8] sm:$0xff] %v1355_v61 }
 0x274   : > { %2008 = shalt.err (!%p2005_p9)
}
 0x275   : > { %s2009_s24 = scalar_lea.hbm %s2269_s15, 256  ;;  %s2013_s11 = scalar_lea.hbm %s2317_s5, 512 }
 0x276   : > { %p2010_p13 = scmp.ne.s32.totalorder %s2269_s15, %s2009_s24  ;;  %p2014_p4 = scmp.lt.s32.totalorder %s2269_s15, %s2317_s5 }
 0x277   : > { %p2015_p8 = scmp.lt.s32.totalorder %s2013_s11, %s2009_s24 }
 0x278   : > { %p2011_p5 = pnand %p2010_p13, %p2333_p10 }
 0x279   : > { %p2016_p7 = por %p2015_p8, %p2014_p4 }
 0x27a   : > { %p2012_p0 = pneg %p2011_p5 }
 0x27c   : > { %p2017_p11 = pnand %p2016_p7, %p2012_p0 }
 0x27e   : > { %2020 = shalt.err (!%p2017_p11)
}
 0x27f   : > { %s2076_s7 = smov 128   ;;  %s2077_s10 = smov 8  }
 0x280   : > { %1655 = dma.vmem_to_hbm [thread:$0]  (%p2333_p10), %s2264_s29, 256, %s2269_s15, %s1361_s16, %s2076_s7, %s2076_s7, %s2077_s10  }
 0x281 PF: > { %s1389_s12 = sand.u32 1, %s2051_s18   ;;  %p2334_p1 = scmp.ne.s32.totalorder %s2323_s25, 0 }
 0x282   : > { %p2335_p2 = scmp.ge.s32.totalorder %s2063_s21, 2  ;;  %s1390_s27 = scalar_lea.sflag [#allocation4], %s1389_s12 }
 0x284   : > { %p1669_p6 = pnand %p2335_p2, %p2334_p1 }
 0x286   : > { %p1670_p12 = pneg %p1669_p6 }
 0x288   : > { %2046 = dma.done.wait (%p1670_p12), %s1390_s27, 256  }
 0x289   : > { %2048 = vsyncadd (%p1670_p12), %s1390_s27, 4294967040  ;;  %p19_p3 = scmp.ge.s32.totalorder %s2180_s17, 4   ;;  %s2336_s18 = smov %s2055_s19 }
 0x28a   : > { %s2337_s19 = smov %s2059_s20  ;;  %s2338_s20 = smov %s2189_s28 }
 0x28b   : > { %s2339_s21 = smov %s2180_s17  ;;  %21 = sbr.rel (!%p19_p3) target bundleno = 6 (0x6), region = 93 }
 0x290   :  { %1395 = vsyncpa [#allocation3], 1 }
 0x291   :  { %1397 = vsyncpa [#allocation3 + $0x1], 1 }
 0x292   :  { %1398 = vsyncpa [#allocation6], 1 }
 0x293   :  { %1399 = vsyncpa [#allocation4], 1 }
 0x294   :  { %1401 = vsyncpa [#allocation4 + $0x1], 1 }

</bundles_post_ra>
